<compile_context>
chip_gen: v7x
topology: tpu7x:2x2x1
jax: 0.10.0
libtpu: 0.0.40
codegen_flags: <defaults>
</compile_context>

<pallas_src>
import functools

import jax
import jax.numpy as jnp
from jax.experimental import pallas as pl
from jax.experimental.pallas import tpu as pltpu


def _conv1x1_nchw_kernel(x_ref, w_ref, b_ref, o_ref):
    # x_ref: (C_in, t_hw)        channels x spatial tile (lane axis = spatial, dense)
    # w_ref: (num_class, C_in)   resident across the whole grid
    # b_ref: (num_class, 1)
    # o_ref: (num_class, t_hw)
    acc = jnp.dot(w_ref[...], x_ref[...], preferred_element_type=jnp.float32)
    o_ref[...] = (acc + b_ref[...]).astype(o_ref.dtype)


def _pick_hw_tile(hw, max_tile):
    """Largest spatial tile <= max_tile that divides hw and keeps lanes aligned."""
    if hw <= max_tile:
        return hw  # single full-spatial block (block == full dim, always legal)
    if hw % 128 == 0:
        cap = (max_tile // 128) * 128
        for cand in range(cap, 0, -128):
            if hw % cand == 0:
                return cand
    # No aligned divisor found: fall back to one full-spatial block (still correct).
    return hw


@functools.partial(jax.jit, static_argnames=("max_hw_tile",))
def classifier_forward(x_nchw, weight, bias, *, max_hw_tile=2048):
    """Forward pass of Classifier (eval mode).

    Args:
      x_nchw: (N, C_in, H, W) float32 input (PyTorch NCHW layout).
      weight: (num_class, C_in) float32 -- Conv2d 1x1 weight with the trailing
              (1, 1) spatial dims squeezed out.
      bias:   (num_class,) float32.
      max_hw_tile: upper bound on the spatial tile size (pixels per grid step).

    Returns:
      (N, num_class, H, W) float32.
    """
    N, C_in, H, W = x_nchw.shape
    num_class = weight.shape[0]
    HW = H * W
    t_hw = _pick_hw_tile(HW, max_hw_tile)

    # Free reshapes only: NCHW is contiguous in (H, W), so no data movement.
    x3 = x_nchw.reshape(N, C_in, HW)
    b2 = bias.reshape(num_class, 1)

    flops = 2 * N * HW * C_in * num_class
    bytes_accessed = 4 * (N * HW * C_in + C_in * num_class + N * HW * num_class + num_class)

    out3 = pl.pallas_call(
        _conv1x1_nchw_kernel,
        out_shape=jax.ShapeDtypeStruct((N, num_class, HW), jnp.float32),
        grid_spec=pltpu.PrefetchScalarGridSpec(
            num_scalar_prefetch=0,
            grid=(N, HW // t_hw),
            in_specs=[
                # (None, ...) squeezes the batch dim out of the kernel ref.
                pl.BlockSpec((None, C_in, t_hw), lambda n, j: (n, 0, j)),
                pl.BlockSpec((num_class, C_in), lambda n, j: (0, 0)),
                pl.BlockSpec((num_class, 1), lambda n, j: (0, 0)),
            ],
            out_specs=pl.BlockSpec((None, num_class, t_hw), lambda n, j: (n, 0, j)),
        ),
        compiler_params=pltpu.CompilerParams(
            dimension_semantics=("parallel", "parallel"),
        ),
        cost_estimate=pl.CostEstimate(
            flops=flops, transcendentals=0, bytes_accessed=bytes_accessed
        ),
    )(x3, weight, b2)

    # Free reshape back to NCHW spatial layout (no transpose needed).
    return out3.reshape(N, num_class, H, W)


if __name__ == "__main__":
    # Module hyperparameters (Conv2d(inputDim, num_class, 1)).
    inputDim = 128
    num_class = 10

    # Small example input consistent with the forward: NCHW.
    N, H, W = 2, 16, 16

    key = jax.random.PRNGKey(0)
    kx, kw, kb = jax.random.split(key, 3)

    x = jax.random.normal(kx, (N, inputDim, H, W), dtype=jnp.float32)
    # Deterministic synthetic parameters (shapes from nn.Conv2d(inputDim, num_class, 1)).
    weight = jax.random.normal(kw, (num_class, inputDim), dtype=jnp.float32) * 0.05
    bias = jax.random.normal(kb, (num_class,), dtype=jnp.float32) * 0.01

    out = classifier_forward(x, weight, bias)
    out = jax.block_until_ready(out)

    # Lightweight self-check against a plain-JAX reference (1x1 conv == einsum).
    ref = jnp.einsum("nchw,kc->nkhw", x, weight) + bias[None, :, None, None]
    assert out.shape == (N, num_class, H, W)
    assert jnp.allclose(out, ref, atol=1e-4, rtol=1e-4)

    print("KERNEL_OK")
</pallas_src>

<mosaic_0001>
module attributes {stable_mosaic.version = 11 : i64} {
  func.func @_conv1x1_nchw_kernel(%arg0: i32, %arg1: i32, %arg2: memref<1x128x256xf32, #tpu.memory_space<vmem>>, %arg3: memref<10x128xf32, #tpu.memory_space<vmem>>, %arg4: memref<10x1xf32, #tpu.memory_space<vmem>>, %arg5: memref<1x10x256xf32, #tpu.memory_space<vmem>>) attributes {dimension_semantics = [#tpu.dimension_semantics<parallel>, #tpu.dimension_semantics<parallel>], iteration_bounds = array<i64: 2, 1>, scalar_prefetch = 0 : i64, scratch_operands = 0 : i64, tpu.core_type = #tpu.core_type<tc>, window_params = [{transform_indices = @transform_0, window_bounds = array<i64: 1, 128, 256>}, {pipeline_mode = #tpu.pipeline_mode<synchronous>, transform_indices = @transform_1, window_bounds = array<i64: 10, 128>}, {pipeline_mode = #tpu.pipeline_mode<synchronous>, transform_indices = @transform_2, window_bounds = array<i64: 10, 1>}, {transform_indices = @transform_3, window_bounds = array<i64: 1, 10, 256>}]} {
    %c0 = arith.constant 0 : index
    %c0_0 = arith.constant 0 : index
    %0 = vector.load %arg3[%c0, %c0_0] : memref<10x128xf32, #tpu.memory_space<vmem>>, vector<10x128xf32>
    %c0_1 = arith.constant 0 : index
    %c0_2 = arith.constant 0 : index
    %c0_3 = arith.constant 0 : index
    %1 = vector.load %arg2[%c0_1, %c0_2, %c0_3] : memref<1x128x256xf32, #tpu.memory_space<vmem>>, vector<1x128x256xf32>
    %2 = vector.shape_cast %1 : vector<1x128x256xf32> to vector<128x256xf32>
    %cst = arith.constant dense<0.000000e+00> : vector<10x256xf32>
    %3 = tpu.matmul %0, %2, %cst {dimension_numbers = #tpu.dot_dimension_numbers<[1], [0], [0], [1], [0, 0, 1, 1], [], []>} : vector<10x128xf32>, vector<128x256xf32>, vector<10x256xf32> -> vector<10x256xf32>
    %c0_4 = arith.constant 0 : index
    %c0_5 = arith.constant 0 : index
    %4 = vector.load %arg4[%c0_4, %c0_5] : memref<10x1xf32, #tpu.memory_space<vmem>>, vector<10x1xf32>
    %5 = vector.broadcast %4 : vector<10x1xf32> to vector<10x256xf32>
    %6 = arith.addf %3, %5 : vector<10x256xf32>
    %c0_6 = arith.constant 0 : index
    %c0_7 = arith.constant 0 : index
    %c0_8 = arith.constant 0 : index
    %7 = vector.load %arg5[%c0_6, %c0_7, %c0_8] : memref<1x10x256xf32, #tpu.memory_space<vmem>>, vector<1x10x256xf32>
    %8 = vector.shape_cast %7 : vector<1x10x256xf32> to vector<10x256xf32>
    %9 = vector.shape_cast %6 : vector<10x256xf32> to vector<1x10x256xf32>
    tpu.vector_store %arg5[%c0_6, %c0_7, %c0_8], %9 {strides = array<i32>} : memref<1x10x256xf32, #tpu.memory_space<vmem>>, vector<1x10x256xf32>,
    return
  }
  func.func @transform_0(%arg0: i32, %arg1: i32) -> (i32, i32, i32) {
    %c0_i32 = arith.constant 0 : i32
    %c0_i32_0 = arith.constant 0 : i32
    return %arg0, %c0_i32, %arg1 : i32, i32, i32
  }
  func.func @transform_1(%arg0: i32, %arg1: i32) -> (i32, i32) {
    %c0_i32 = arith.constant 0 : i32
    %c0_i32_0 = arith.constant 0 : i32
    %c0_i32_1 = arith.constant 0 : i32
    return %c0_i32, %c0_i32_0 : i32, i32
  }
  func.func @transform_2(%arg0: i32, %arg1: i32) -> (i32, i32) {
    %c0_i32 = arith.constant 0 : i32
    %c0_i32_0 = arith.constant 0 : i32
    %c0_i32_1 = arith.constant 0 : i32
    return %c0_i32, %c0_i32_0 : i32, i32
  }
  func.func @transform_3(%arg0: i32, %arg1: i32) -> (i32, i32, i32) {
    %c0_i32 = arith.constant 0 : i32
    %c0_i32_0 = arith.constant 0 : i32
    return %arg0, %c0_i32, %arg1 : i32, i32, i32
  }
}

</mosaic_0001>

<bundles_post_ra>
// kernel: classifier_forward.1
= control target key start
LH: loop header
LB: loop body
LE: loop exit
PB: predicated region body
PF: predicated region fallthrough
CT: control target
= control target key end

     0   :  { %s558_s12 = smov 0   ;;  %s560_s13 = smov 0   ;;  %s641_s0 = inlined_call_operand.vmem [shape: f32[2,128,256], index: 0, kind: input, shape index: {}]   ;;  %s642_s1 = inlined_call_operand.vmem [shape: f32[10,128], index: 1, kind: input, shape index: {}]   ;;  %s643_s2 = inlined_call_operand.vmem [shape: f32[10,1], index: 2, kind: input, shape index: {}]   ;;  %s644_s3 = inlined_call_operand.vmem [shape: f32[2,10,256], index: 3, kind: output, shape index: {}]  }
   0x1   :  { %s562_s14 = smov 0  }
   0x2 LB: > { %s25_s15 = sadd.s32 1, %s530_s13  ;;  %p428_p0 = scmp.ge.s32.totalorder %s534_s14, 1  ;;  %s534_s14 = sphi %s562_s14, %s13_s14   ;;  %s530_s13 = sphi %s560_s13, %s646_s13   ;;  %s526_s12 = sphi %s558_s12, %s645_s12  }
   0x3   : > { %p27_p1 = scmp.ge.s32.totalorder %s25_s15, 2  ;;  %p158_p2 = scmp.lt.s32.totalorder %s534_s14, 3 }
   0x5   : > { %s648_s15 = smov (%p27_p1, %s25_s15), 0  ;;  %p159_p3 = pnand %p428_p0, %p158_p2 }
   0x6   : > { %p191_p4 = scmp.lt.s32.totalorder (!%p159_p3), %s526_s12, 1  ;;  %v536_v0 = vmov (!%p159_p3), 0.0   ;;  %v244_v1 = vld [vmem:[%s643_s2] sm:$0xff] (!%p159_p3)  ;;  %v537_v2 = vmov (!%p159_p3), 0   ;;  %v245_v3 = vld [vmem:[%s643_s2 + $0x8] sm:$0x3] (!%p159_p3) }
   0x7   : > { %162 = sbr.rel (%p159_p3) target bundleno = 268 (0x10c), region = 32  ;;  %320 = vmatprep.mubr.f32.mxu0 (!%p159_p3), %v536_v0  ;;  %326 = vmatprep.mubr.f32.mxu1 (!%p159_p3), %v536_v0  ;;  %v210_v52 = vld [vmem:[%s642_s1] sm:$0xff] (!%p159_p3)  ;;  %v211_v53 = vld [vmem:[%s642_s1 + $0x8] sm:$0x3] (!%p159_p3) }
   0x8   : > { %511 = vset.pattern.permute.xlu0 (!%p159_p3), %v537_v2 }
   0x9   : > { %248 = vperm.xlu0 (!%p159_p3), %511, %v244_v1  }
   0xd   : > { %253 = vperm.xlu0 (!%p159_p3), %511, %v245_v3  }
   0xe   : > { %s650_s12 = smov (!%p191_p4, %s526_s12), 1 }
   0xf   : > { %s435_s18 = sshll.u32 %s650_s12, 8  ;;  %s436_s28 = sshll.u32 %s650_s12, 5 }
  0x10   : > { %s588_s23 = scalar_lea.vmem %s641_s0, %s435_s18  ;;  %s208_s4 = scalar_lea.vmem %s644_s3, %s436_s28 }
  0x11   : > { %v213_v4 = vld [vmem:[%s588_s23 + $0x8] sm:$0xff]  ;;  %v215_v5 = vld [vmem:[%s588_s23 + $0x18] sm:$0xff]  ;;  %v212_v6 = vld [vmem:[%s588_s23] sm:$0xff] }
  0x12   : > { %v437_v7 = vpack.c.bf16 %v215_v5, %v213_v4  ;;  %v214_v8 = vld [vmem:[%s588_s23 + $0x10] sm:$0xff]  ;;  %v217_v9 = vld [vmem:[%s588_s23 + $0x28] sm:$0xff]  ;;  %v219_v10 = vld [vmem:[%s588_s23 + $0x38] sm:$0xff] }
  0x13   : > { %v439_v11 = vpack.c.bf16 %v214_v8, %v212_v6  ;;  %v441_v12 = vpack.c.bf16 %v219_v10, %v217_v9  ;;  %v216_v13 = vld [vmem:[%s588_s23 + $0x20] sm:$0xff]  ;;  %v218_v14 = vld [vmem:[%s588_s23 + $0x30] sm:$0xff]  ;;  %v221_v15 = vld [vmem:[%s588_s23 + $0x48] sm:$0xff] }
  0x14   : > { %438 = vmatprep.subr.bf16.mxu0 %v437_v7  ;;  %469 = vmatprep.subr.bf16.mxu1 %v437_v7  ;;  %v223_v16 = vld [vmem:[%s588_s23 + $0x58] sm:$0xff]  ;;  %v443_v17 = vpack.c.bf16 %v218_v14, %v216_v13  ;;  %v220_v19 = vld [vmem:[%s588_s23 + $0x40] sm:$0xff]  ;;  %v222_v20 = vld [vmem:[%s588_s23 + $0x50] sm:$0xff] }
  0x15   : > { %440 = vmatpush1.bf16.msra.mxu0 %v439_v11  ;;  %477 = vmatpush1.bf16.msra.mxu1 %v439_v11  ;;  %v445_v18 = vpack.c.bf16 %v223_v16, %v221_v15  ;;  %v225_v21 = vld [vmem:[%s588_s23 + $0x68] sm:$0xff]  ;;  %v227_v22 = vld [vmem:[%s588_s23 + $0x78] sm:$0xff]  ;;  %v447_v23 = vpack.c.bf16 %v222_v20, %v220_v19  ;;  %v224_v25 = vld [vmem:[%s588_s23 + $0x60] sm:$0xff] }
  0x16   : > { %442 = vmatprep.subr.bf16.mxu0 %v441_v12  ;;  %470 = vmatprep.subr.bf16.mxu1 %v441_v12  ;;  %v449_v24 = vpack.c.bf16 %v227_v22, %v225_v21  ;;  %v226_v26 = vld [vmem:[%s588_s23 + $0x70] sm:$0xff]  ;;  %v229_v27 = vld [vmem:[%s588_s23 + $0x88] sm:$0xff]  ;;  %v231_v28 = vld [vmem:[%s588_s23 + $0x98] sm:$0xff] }
  0x17   : > { %v451_v29 = vpack.c.bf16 %v226_v26, %v224_v25  ;;  %v453_v30 = vpack.c.bf16 %v231_v28, %v229_v27  ;;  %v228_v31 = vld [vmem:[%s588_s23 + $0x80] sm:$0xff]  ;;  %v230_v32 = vld [vmem:[%s588_s23 + $0x90] sm:$0xff]  ;;  %v233_v33 = vld [vmem:[%s588_s23 + $0xa8] sm:$0xff] }
  0x18   : > { %v235_v34 = vld [vmem:[%s588_s23 + $0xb8] sm:$0xff]  ;;  %v455_v35 = vpack.c.bf16 %v230_v32, %v228_v31  ;;  %v232_v37 = vld [vmem:[%s588_s23 + $0xa0] sm:$0xff]  ;;  %v234_v38 = vld [vmem:[%s588_s23 + $0xb0] sm:$0xff] }
  0x19   : > { %444 = vmatpush1.bf16.msra.mxu0 %v443_v17  ;;  %478 = vmatpush1.bf16.msra.mxu1 %v443_v17  ;;  %v457_v36 = vpack.c.bf16 %v235_v34, %v233_v33  ;;  %v237_v39 = vld [vmem:[%s588_s23 + $0xc8] sm:$0xff]  ;;  %v239_v40 = vld [vmem:[%s588_s23 + $0xd8] sm:$0xff]  ;;  %v459_v41 = vpack.c.bf16 %v234_v38, %v232_v37  ;;  %v236_v43 = vld [vmem:[%s588_s23 + $0xc0] sm:$0xff] }
  0x1a   : > { %446 = vmatprep.subr.bf16.mxu0 %v445_v18  ;;  %471 = vmatprep.subr.bf16.mxu1 %v445_v18  ;;  %v461_v42 = vpack.c.bf16 %v239_v40, %v237_v39  ;;  %v238_v44 = vld [vmem:[%s588_s23 + $0xd0] sm:$0xff]  ;;  %v241_v45 = vld [vmem:[%s588_s23 + $0xe8] sm:$0xff]  ;;  %v243_v46 = vld [vmem:[%s588_s23 + $0xf8] sm:$0xff] }
  0x1b   : > { %v463_v47 = vpack.c.bf16 %v238_v44, %v236_v43  ;;  %v465_v48 = vpack.c.bf16 %v243_v46, %v241_v45  ;;  %v240_v49 = vld [vmem:[%s588_s23 + $0xe0] sm:$0xff]  ;;  %v242_v50 = vld [vmem:[%s588_s23 + $0xf0] sm:$0xff] }
  0x1c   : > { %v467_v51 = vpack.c.bf16 %v242_v50, %v240_v49 }
  0x1d   : > { %448 = vmatpush1.bf16.msra.mxu0 %v447_v23  ;;  %479 = vmatpush1.bf16.msra.mxu1 %v447_v23 }
  0x1e   : > { %450 = vmatprep.subr.bf16.mxu0 %v449_v24  ;;  %472 = vmatprep.subr.bf16.mxu1 %v449_v24 }
  0x21   : > { %452 = vmatpush1.bf16.msra.mxu0 %v451_v29  ;;  %480 = vmatpush1.bf16.msra.mxu1 %v451_v29 }
  0x22   : > { %454 = vmatprep.subr.bf16.mxu0 %v453_v30  ;;  %473 = vmatprep.subr.bf16.mxu1 %v453_v30 }
  0x25   : > { %456 = vmatpush1.bf16.msra.mxu0 %v455_v35  ;;  %481 = vmatpush1.bf16.msra.mxu1 %v455_v35 }
  0x26   : > { %458 = vmatprep.subr.bf16.mxu0 %v457_v36  ;;  %474 = vmatprep.subr.bf16.mxu1 %v457_v36 }
  0x29   : > { %460 = vmatpush1.bf16.msra.mxu0 %v459_v41  ;;  %482 = vmatpush1.bf16.msra.mxu1 %v459_v41 }
  0x2a   : > { %462 = vmatprep.subr.bf16.mxu0 %v461_v42  ;;  %475 = vmatprep.subr.bf16.mxu1 %v461_v42 }
  0x2d   : > { %464 = vmatpush1.bf16.msra.mxu0 %v463_v47  ;;  %483 = vmatpush1.bf16.msra.mxu1 %v463_v47 }
  0x2e   : > { %466 = vmatprep.subr.bf16.mxu0 %v465_v48  ;;  %476 = vmatprep.subr.bf16.mxu1 %v465_v48 }
  0x31   : > { %468 = vmatpush1.bf16.msra.mxu0 %v467_v51  ;;  %484 = vmatpush1.bf16.msra.mxu1 %v467_v51 }
  0x34   : > { %321 = vmatmul.mubr.f32.vlgmr.msra.gmra.mrb[0].mxu0 %v210_v52  ;;  %327 = vmatmul.mubr.f32.vlgmr.msra.gmra.mrb[0].mxu1 %v211_v53 }
  0x88   : > { %v249_v54 = vpop.permute.xlu0 %248 }
  0x8c   : > { %v254_v55 = vpop.permute.xlu0 %253 }
 0x107   : > { %v322_v56 = vpop.f32.mrb[0].mxu0  ;;  %v328_v57 = vpop.f32.mrb[0].mxu1 }
 0x108   : > { %v323_v58 = vadd.f32 %v322_v56, %v249_v54  ;;  %v329_v59 = vadd.f32 %v328_v57, %v254_v55  ;;  %v324_v60 = vpop.f32.mrb[1].mxu0  ;;  %v330_v61 = vpop.f32.mrb[1].mxu1 }
 0x109   : > { %v325_v62 = vadd.f32 %v324_v60, %v249_v54  ;;  %v331_v63 = vadd.f32 %v330_v61, %v254_v55 }
 0x10a   : > { %333 = vst [vmem:[%s208_s4] sm:$0xff] %v323_v58  ;;  %335 = vst [vmem:[%s208_s4 + $0x10] sm:$0x3] %v329_v59 }
 0x10b   : > { %334 = vst [vmem:[%s208_s4 + $0x8] sm:$0xff] %v325_v62  ;;  %336 = vst [vmem:[%s208_s4 + $0x18] sm:$0x3] %v331_v63 }
 0x10c PF: > { %s13_s14 = sadd.s32 1, %s534_s14   ;;  %s645_s12 = smov %s530_s13 }
 0x10d   : > { %p10_p5 = scmp.ge.s32.totalorder %s13_s14, 4   ;;  %s646_s13 = smov %s648_s15 }
 0x10f   :  { %12 = sbr.rel (!%p10_p5) target bundleno = 2 (0x2), region = 62 }

</bundles_post_ra>
